<compile_context>
chip_gen: v7x
topology: tpu7x:2x2x1
jax: 0.10.0
libtpu: 0.0.40
codegen_flags: <defaults>
</compile_context>

<pallas_src>
import numpy as np
import jax
import jax.numpy as jnp
from jax.experimental import pallas as pl
from jax.experimental.pallas import tpu as pltpu

D_in = 1
H = 24
D_out = 1

_LANES = 128
_SUBLANES = 8
_MIN_GRID_STEPS = 4  # keep >=4 grid steps: pipelining depth + v7x 2-TC sharding


def _folded_kernel_factory(signs):
    """4 VPU ops / hidden unit. w2 folded into layer 1: p = w1*w2, q = b1*w2.
    max(x*w1+b1, 0)*w2 == max(p*x+q, 0) if w2>0 else min(p*x+q, 0)."""

    def kernel(p_ref, q_ref, b2_ref, x_ref, o_ref):
        x = x_ref[...]
        acc = jnp.full_like(x, b2_ref[0])
        for j, s in enumerate(signs):          # static unroll over hidden units
            if s == 0:
                continue
            t = x * p_ref[j] + q_ref[j]
            acc = acc + (jnp.maximum(t, 0.0) if s > 0 else jnp.minimum(t, 0.0))
        o_ref[...] = acc.astype(o_ref.dtype)

    return kernel


def _generic_kernel(w1_ref, b1_ref, w2_ref, b2_ref, x_ref, o_ref):
    """5 VPU ops / hidden unit; used when w2's signs are unknown at trace time."""
    x = x_ref[...]
    acc = jnp.full_like(x, b2_ref[0])
    for j in range(H):                         # static unroll
        h = jnp.maximum(x * w1_ref[j] + b1_ref[j], 0.0)
        acc = acc + h * w2_ref[j]
    o_ref[...] = acc.astype(o_ref.dtype)


def _concrete_signs(w2):
    """Signs of w2 if concrete (outside jit), else None."""
    try:
        w2_host = np.asarray(w2)
    except Exception:  # tracer under jit -> fall back to the generic kernel
        return None
    return tuple(int(s) for s in np.sign(w2_host))


def _choose_block_rows(rows, cap):
    """Block row count: multiple of 8, <= cap, aiming for >= _MIN_GRID_STEPS blocks."""
    if rows <= _SUBLANES:
        return rows  # single full-extent block
    target = pl.cdiv(rows, _MIN_GRID_STEPS)
    br = ((max(target, _SUBLANES) + _SUBLANES - 1) // _SUBLANES) * _SUBLANES
    br = min(br, cap, (rows // _SUBLANES) * _SUBLANES)
    return max(br, _SUBLANES)


def net_forward(x, w1, b1, w2, b2, *, block_rows=4096):
    """Forward pass of Net.

    x:  (N, 1)  f32
    w1: (H,)    f32  (== linear1.weight.reshape(H), valid since D_in == 1)
    b1: (H,)    f32  (== linear1.bias)
    w2: (H,)    f32  (== linear2.weight.reshape(H), valid since D_out == 1)
    b2: (1,)    f32  (== linear2.bias)
    returns (N, 1) f32
    """
    n = x.shape[0]
    x_flat = x.reshape(-1).astype(jnp.float32)

    # Lane-dense layout: view the batch as (rows, 128). Pad only to the next
    # 128-lane multiple (single jnp.pad of <=127 zeros, skipped if aligned).
    rows = pl.cdiv(n, _LANES)
    n_pad = rows * _LANES
    if n_pad != n:
        x_flat = jnp.pad(x_flat, (0, n_pad - n))
    x2d = x_flat.reshape(rows, _LANES)

    br = _choose_block_rows(rows, block_rows)
    grid = (pl.cdiv(rows, br),)  # trailing block may be partial (writes masked)

    smem = pl.BlockSpec(memory_space=pltpu.MemorySpace.SMEM)

    signs = _concrete_signs(w2)
    if signs is not None:
        kernel = _folded_kernel_factory(signs)
        scalar_args = (w1 * w2, b1 * w2, b2)     # fold w2 into layer 1
        flops_per_elem = 4 * H
    else:
        kernel = _generic_kernel
        scalar_args = (w1, b1, w2, b2)
        flops_per_elem = 5 * H

    out2d = pl.pallas_call(
        kernel,
        out_shape=jax.ShapeDtypeStruct((rows, _LANES), jnp.float32),
        grid=grid,
        in_specs=[smem] * len(scalar_args)
        + [pl.BlockSpec((br, _LANES), lambda i: (i, 0))],
        out_specs=pl.BlockSpec((br, _LANES), lambda i: (i, 0)),
        compiler_params=pltpu.CompilerParams(
            # Batch axis is fully independent -> shard across v7x's 2 TCs;
            # harmless on single-TC v5e/v6e.
            dimension_semantics=("parallel",),
            # <=2 MiB per block, double-buffered in+out (<=8 MiB total):
            # well under the 32 MiB scoped limit on all generations.
            vmem_limit_bytes=32 * 1024 * 1024,
        ),
        cost_estimate=pl.CostEstimate(
            flops=flops_per_elem * n_pad,
            transcendentals=0,
            bytes_accessed=8 * n_pad,  # read 4B + write 4B per element
        ),
    )(*[a.astype(jnp.float32) for a in scalar_args], x2d)

    out_flat = out2d.reshape(-1)
    if n_pad != n:
        out_flat = out_flat[:n]
    return out_flat.reshape(n, D_out)


def init_params(key):
    """Deterministic init matching nn.Linear's default (flattened for D_in=D_out=1)."""
    k1, k2, k3, k4 = jax.random.split(key, 4)
    bound1 = 1.0 / (D_in ** 0.5)
    bound2 = 1.0 / (H ** 0.5)
    w1 = jax.random.uniform(k1, (H,), jnp.float32, -bound1, bound1)
    b1 = jax.random.uniform(k2, (H,), jnp.float32, -bound1, bound1)
    w2 = jax.random.uniform(k3, (H,), jnp.float32, -bound2, bound2)
    b2 = jax.random.uniform(k4, (1,), jnp.float32, -bound2, bound2)
    return w1, b1, w2, b2


def _reference(x, w1, b1, w2, b2):
    # Same math as the PyTorch forward (matmul form).
    h = jnp.maximum(x @ w1.reshape(D_in, H) + b1.reshape(1, H), 0.0)
    return h @ w2.reshape(H, D_out) + b2.reshape(1, D_out)


if __name__ == "__main__":
    key = jax.random.PRNGKey(0)
    pkey, xkey1, xkey2 = jax.random.split(key, 3)
    w1, b1, w2, b2 = init_params(pkey)

    # Small batch (N, D_in) = (8, 1): single full-extent block, padded lanes.
    x_small = jax.random.normal(xkey1, (8, D_in), jnp.float32)
    out_small = jax.block_until_ready(net_forward(x_small, w1, b1, w2, b2))
    ref_small = _reference(x_small, w1, b1, w2, b2)
    assert out_small.shape == (8, D_out)
    assert jnp.allclose(out_small, ref_small, atol=1e-5), "small-batch mismatch"

    # Moderate batch: rows=40 -> 3 grid steps of 16 rows, partial last block.
    n_med = 5000
    x_med = jax.random.normal(xkey2, (n_med, D_in), jnp.float32)
    out_med = jax.block_until_ready(net_forward(x_med, w1, b1, w2, b2))
    ref_med = _reference(x_med, w1, b1, w2, b2)
    assert out_med.shape == (n_med, D_out)
    assert jnp.allclose(out_med, ref_med, atol=1e-5), "medium-batch mismatch"

    # Generic (sign-agnostic) kernel path: params are tracers under jit.
    out_jit = jax.block_until_ready(jax.jit(net_forward)(x_med, w1, b1, w2, b2))
    assert jnp.allclose(out_jit, ref_med, atol=1e-5), "jit-path mismatch"

    print("KERNEL_OK")
</pallas_src>

<mosaic_0001>
module attributes {stable_mosaic.version = 11 : i64} {
  func.func @kernel(%arg0: i32, %arg1: memref<24xf32, #tpu.memory_space<smem>>, %arg2: memref<24xf32, #tpu.memory_space<smem>>, %arg3: memref<1xf32, #tpu.memory_space<smem>>, %arg4: memref<1x128xf32, #tpu.memory_space<vmem>>, %arg5: memref<1x128xf32, #tpu.memory_space<vmem>>) attributes {dimension_semantics = [#tpu.dimension_semantics<parallel>], iteration_bounds = array<i64: 1>, scalar_prefetch = 0 : i64, scratch_operands = 0 : i64, tpu.core_type = #tpu.core_type<tc>, window_params = [{transform_indices = @transform_0, window_bounds = array<i64: 24>}, {transform_indices = @transform_1, window_bounds = array<i64: 24>}, {transform_indices = @transform_2, window_bounds = array<i64: 1>}, {transform_indices = @transform_3, window_bounds = array<i64: 1, 128>}, {transform_indices = @transform_4, window_bounds = array<i64: 1, 128>}]} {
    %c0 = arith.constant 0 : index
    %c0_0 = arith.constant 0 : index
    %0 = vector.load %arg4[%c0, %c0_0] : memref<1x128xf32, #tpu.memory_space<vmem>>, vector<1x128xf32>
    %c0_1 = arith.constant 0 : index
    %1 = memref.load %arg3[%c0_1] : memref<1xf32, #tpu.memory_space<smem>>
    %2 = vector.broadcast %1 : f32 to vector<1x128xf32>
    %c0_2 = arith.constant 0 : index
    %3 = memref.load %arg1[%c0_2] : memref<24xf32, #tpu.memory_space<smem>>
    %4 = vector.broadcast %3 : f32 to vector<1x128xf32>
    %5 = arith.mulf %0, %4 : vector<1x128xf32>
    %c0_3 = arith.constant 0 : index
    %6 = memref.load %arg2[%c0_3] : memref<24xf32, #tpu.memory_space<smem>>
    %7 = vector.broadcast %6 : f32 to vector<1x128xf32>
    %8 = arith.addf %5, %7 : vector<1x128xf32>
    %cst = arith.constant 0.000000e+00 : f32
    %9 = vector.broadcast %cst : f32 to vector<1x128xf32>
    %10 = arith.minimumf %8, %9 : vector<1x128xf32>
    %11 = arith.addf %2, %10 : vector<1x128xf32>
    %c1 = arith.constant 1 : index
    %12 = memref.load %arg1[%c1] : memref<24xf32, #tpu.memory_space<smem>>
    %13 = vector.broadcast %12 : f32 to vector<1x128xf32>
    %14 = arith.mulf %0, %13 : vector<1x128xf32>
    %c1_4 = arith.constant 1 : index
    %15 = memref.load %arg2[%c1_4] : memref<24xf32, #tpu.memory_space<smem>>
    %16 = vector.broadcast %15 : f32 to vector<1x128xf32>
    %17 = arith.addf %14, %16 : vector<1x128xf32>
    %cst_5 = arith.constant 0.000000e+00 : f32
    %18 = vector.broadcast %cst_5 : f32 to vector<1x128xf32>
    %19 = arith.maximumf %17, %18 : vector<1x128xf32>
    %20 = arith.addf %11, %19 : vector<1x128xf32>
    %c2 = arith.constant 2 : index
    %21 = memref.load %arg1[%c2] : memref<24xf32, #tpu.memory_space<smem>>
    %22 = vector.broadcast %21 : f32 to vector<1x128xf32>
    %23 = arith.mulf %0, %22 : vector<1x128xf32>
    %c2_6 = arith.constant 2 : index
    %24 = memref.load %arg2[%c2_6] : memref<24xf32, #tpu.memory_space<smem>>
    %25 = vector.broadcast %24 : f32 to vector<1x128xf32>
    %26 = arith.addf %23, %25 : vector<1x128xf32>
    %cst_7 = arith.constant 0.000000e+00 : f32
    %27 = vector.broadcast %cst_7 : f32 to vector<1x128xf32>
    %28 = arith.minimumf %26, %27 : vector<1x128xf32>
    %29 = arith.addf %20, %28 : vector<1x128xf32>
    %c3 = arith.constant 3 : index
    %30 = memref.load %arg1[%c3] : memref<24xf32, #tpu.memory_space<smem>>
    %31 = vector.broadcast %30 : f32 to vector<1x128xf32>
    %32 = arith.mulf %0, %31 : vector<1x128xf32>
    %c3_8 = arith.constant 3 : index
    %33 = memref.load %arg2[%c3_8] : memref<24xf32, #tpu.memory_space<smem>>
    %34 = vector.broadcast %33 : f32 to vector<1x128xf32>
    %35 = arith.addf %32, %34 : vector<1x128xf32>
    %cst_9 = arith.constant 0.000000e+00 : f32
    %36 = vector.broadcast %cst_9 : f32 to vector<1x128xf32>
    %37 = arith.minimumf %35, %36 : vector<1x128xf32>
    %38 = arith.addf %29, %37 : vector<1x128xf32>
    %c4 = arith.constant 4 : index
    %39 = memref.load %arg1[%c4] : memref<24xf32, #tpu.memory_space<smem>>
    %40 = vector.broadcast %39 : f32 to vector<1x128xf32>
    %41 = arith.mulf %0, %40 : vector<1x128xf32>
    %c4_10 = arith.constant 4 : index
    %42 = memref.load %arg2[%c4_10] : memref<24xf32, #tpu.memory_space<smem>>
    %43 = vector.broadcast %42 : f32 to vector<1x128xf32>
    %44 = arith.addf %41, %43 : vector<1x128xf32>
    %cst_11 = arith.constant 0.000000e+00 : f32
    %45 = vector.broadcast %cst_11 : f32 to vector<1x128xf32>
    %46 = arith.maximumf %44, %45 : vector<1x128xf32>
    %47 = arith.addf %38, %46 : vector<1x128xf32>
    %c5 = arith.constant 5 : index
    %48 = memref.load %arg1[%c5] : memref<24xf32, #tpu.memory_space<smem>>
    %49 = vector.broadcast %48 : f32 to vector<1x128xf32>
    %50 = arith.mulf %0, %49 : vector<1x128xf32>
    %c5_12 = arith.constant 5 : index
    %51 = memref.load %arg2[%c5_12] : memref<24xf32, #tpu.memory_space<smem>>
    %52 = vector.broadcast %51 : f32 to vector<1x128xf32>
    %53 = arith.addf %50, %52 : vector<1x128xf32>
    %cst_13 = arith.constant 0.000000e+00 : f32
    %54 = vector.broadcast %cst_13 : f32 to vector<1x128xf32>
    %55 = arith.maximumf %53, %54 : vector<1x128xf32>
    %56 = arith.addf %47, %55 : vector<1x128xf32>
    %c6 = arith.constant 6 : index
    %57 = memref.load %arg1[%c6] : memref<24xf32, #tpu.memory_space<smem>>
    %58 = vector.broadcast %57 : f32 to vector<1x128xf32>
    %59 = arith.mulf %0, %58 : vector<1x128xf32>
    %c6_14 = arith.constant 6 : index
    %60 = memref.load %arg2[%c6_14] : memref<24xf32, #tpu.memory_space<smem>>
    %61 = vector.broadcast %60 : f32 to vector<1x128xf32>
    %62 = arith.addf %59, %61 : vector<1x128xf32>
    %cst_15 = arith.constant 0.000000e+00 : f32
    %63 = vector.broadcast %cst_15 : f32 to vector<1x128xf32>
    %64 = arith.maximumf %62, %63 : vector<1x128xf32>
    %65 = arith.addf %56, %64 : vector<1x128xf32>
    %c7 = arith.constant 7 : index
    %66 = memref.load %arg1[%c7] : memref<24xf32, #tpu.memory_space<smem>>
    %67 = vector.broadcast %66 : f32 to vector<1x128xf32>
    %68 = arith.mulf %0, %67 : vector<1x128xf32>
    %c7_16 = arith.constant 7 : index
    %69 = memref.load %arg2[%c7_16] : memref<24xf32, #tpu.memory_space<smem>>
    %70 = vector.broadcast %69 : f32 to vector<1x128xf32>
    %71 = arith.addf %68, %70 : vector<1x128xf32>
    %cst_17 = arith.constant 0.000000e+00 : f32
    %72 = vector.broadcast %cst_17 : f32 to vector<1x128xf32>
    %73 = arith.maximumf %71, %72 : vector<1x128xf32>
    %74 = arith.addf %65, %73 : vector<1x128xf32>
    %c8 = arith.constant 8 : index
    %75 = memref.load %arg1[%c8] : memref<24xf32, #tpu.memory_space<smem>>
    %76 = vector.broadcast %75 : f32 to vector<1x128xf32>
    %77 = arith.mulf %0, %76 : vector<1x128xf32>
    %c8_18 = arith.constant 8 : index
    %78 = memref.load %arg2[%c8_18] : memref<24xf32, #tpu.memory_space<smem>>
    %79 = vector.broadcast %78 : f32 to vector<1x128xf32>
    %80 = arith.addf %77, %79 : vector<1x128xf32>
    %cst_19 = arith.constant 0.000000e+00 : f32
    %81 = vector.broadcast %cst_19 : f32 to vector<1x128xf32>
    %82 = arith.minimumf %80, %81 : vector<1x128xf32>
    %83 = arith.addf %74, %82 : vector<1x128xf32>
    %c9 = arith.constant 9 : index
    %84 = memref.load %arg1[%c9] : memref<24xf32, #tpu.memory_space<smem>>
    %85 = vector.broadcast %84 : f32 to vector<1x128xf32>
    %86 = arith.mulf %0, %85 : vector<1x128xf32>
    %c9_20 = arith.constant 9 : index
    %87 = memref.load %arg2[%c9_20] : memref<24xf32, #tpu.memory_space<smem>>
    %88 = vector.broadcast %87 : f32 to vector<1x128xf32>
    %89 = arith.addf %86, %88 : vector<1x128xf32>
    %cst_21 = arith.constant 0.000000e+00 : f32
    %90 = vector.broadcast %cst_21 : f32 to vector<1x128xf32>
    %91 = arith.maximumf %89, %90 : vector<1x128xf32>
    %92 = arith.addf %83, %91 : vector<1x128xf32>
    %c10 = arith.constant 10 : index
    %93 = memref.load %arg1[%c10] : memref<24xf32, #tpu.memory_space<smem>>
    %94 = vector.broadcast %93 : f32 to vector<1x128xf32>
    %95 = arith.mulf %0, %94 : vector<1x128xf32>
    %c10_22 = arith.constant 10 : index
    %96 = memref.load %arg2[%c10_22] : memref<24xf32, #tpu.memory_space<smem>>
    %97 = vector.broadcast %96 : f32 to vector<1x128xf32>
    %98 = arith.addf %95, %97 : vector<1x128xf32>
    %cst_23 = arith.constant 0.000000e+00 : f32
    %99 = vector.broadcast %cst_23 : f32 to vector<1x128xf32>
    %100 = arith.minimumf %98, %99 : vector<1x128xf32>
    %101 = arith.addf %92, %100 : vector<1x128xf32>
    %c11 = arith.constant 11 : index
    %102 = memref.load %arg1[%c11] : memref<24xf32, #tpu.memory_space<smem>>
    %103 = vector.broadcast %102 : f32 to vector<1x128xf32>
    %104 = arith.mulf %0, %103 : vector<1x128xf32>
    %c11_24 = arith.constant 11 : index
    %105 = memref.load %arg2[%c11_24] : memref<24xf32, #tpu.memory_space<smem>>
    %106 = vector.broadcast %105 : f32 to vector<1x128xf32>
    %107 = arith.addf %104, %106 : vector<1x128xf32>
    %cst_25 = arith.constant 0.000000e+00 : f32
    %108 = vector.broadcast %cst_25 : f32 to vector<1x128xf32>
    %109 = arith.maximumf %107, %108 : vector<1x128xf32>
    %110 = arith.addf %101, %109 : vector<1x128xf32>
    %c12 = arith.constant 12 : index
    %111 = memref.load %arg1[%c12] : memref<24xf32, #tpu.memory_space<smem>>
    %112 = vector.broadcast %111 : f32 to vector<1x128xf32>
    %113 = arith.mulf %0, %112 : vector<1x128xf32>
    %c12_26 = arith.constant 12 : index
    %114 = memref.load %arg2[%c12_26] : memref<24xf32, #tpu.memory_space<smem>>
    %115 = vector.broadcast %114 : f32 to vector<1x128xf32>
    %116 = arith.addf %113, %115 : vector<1x128xf32>
    %cst_27 = arith.constant 0.000000e+00 : f32
    %117 = vector.broadcast %cst_27 : f32 to vector<1x128xf32>
    %118 = arith.maximumf %116, %117 : vector<1x128xf32>
    %119 = arith.addf %110, %118 : vector<1x128xf32>
    %c13 = arith.constant 13 : index
    %120 = memref.load %arg1[%c13] : memref<24xf32, #tpu.memory_space<smem>>
    %121 = vector.broadcast %120 : f32 to vector<1x128xf32>
    %122 = arith.mulf %0, %121 : vector<1x128xf32>
    %c13_28 = arith.constant 13 : index
    %123 = memref.load %arg2[%c13_28] : memref<24xf32, #tpu.memory_space<smem>>
    %124 = vector.broadcast %123 : f32 to vector<1x128xf32>
    %125 = arith.addf %122, %124 : vector<1x128xf32>
    %cst_29 = arith.constant 0.000000e+00 : f32
    %126 = vector.broadcast %cst_29 : f32 to vector<1x128xf32>
    %127 = arith.maximumf %125, %126 : vector<1x128xf32>
    %128 = arith.addf %119, %127 : vector<1x128xf32>
    %c14 = arith.constant 14 : index
    %129 = memref.load %arg1[%c14] : memref<24xf32, #tpu.memory_space<smem>>
    %130 = vector.broadcast %129 : f32 to vector<1x128xf32>
    %131 = arith.mulf %0, %130 : vector<1x128xf32>
    %c14_30 = arith.constant 14 : index
    %132 = memref.load %arg2[%c14_30] : memref<24xf32, #tpu.memory_space<smem>>
    %133 = vector.broadcast %132 : f32 to vector<1x128xf32>
    %134 = arith.addf %131, %133 : vector<1x128xf32>
    %cst_31 = arith.constant 0.000000e+00 : f32
    %135 = vector.broadcast %cst_31 : f32 to vector<1x128xf32>
    %136 = arith.minimumf %134, %135 : vector<1x128xf32>
    %137 = arith.addf %128, %136 : vector<1x128xf32>
    %c15 = arith.constant 15 : index
    %138 = memref.load %arg1[%c15] : memref<24xf32, #tpu.memory_space<smem>>
    %139 = vector.broadcast %138 : f32 to vector<1x128xf32>
    %140 = arith.mulf %0, %139 : vector<1x128xf32>
    %c15_32 = arith.constant 15 : index
    %141 = memref.load %arg2[%c15_32] : memref<24xf32, #tpu.memory_space<smem>>
    %142 = vector.broadcast %141 : f32 to vector<1x128xf32>
    %143 = arith.addf %140, %142 : vector<1x128xf32>
    %cst_33 = arith.constant 0.000000e+00 : f32
    %144 = vector.broadcast %cst_33 : f32 to vector<1x128xf32>
    %145 = arith.maximumf %143, %144 : vector<1x128xf32>
    %146 = arith.addf %137, %145 : vector<1x128xf32>
    %c16 = arith.constant 16 : index
    %147 = memref.load %arg1[%c16] : memref<24xf32, #tpu.memory_space<smem>>
    %148 = vector.broadcast %147 : f32 to vector<1x128xf32>
    %149 = arith.mulf %0, %148 : vector<1x128xf32>
    %c16_34 = arith.constant 16 : index
    %150 = memref.load %arg2[%c16_34] : memref<24xf32, #tpu.memory_space<smem>>
    %151 = vector.broadcast %150 : f32 to vector<1x128xf32>
    %152 = arith.addf %149, %151 : vector<1x128xf32>
    %cst_35 = arith.constant 0.000000e+00 : f32
    %153 = vector.broadcast %cst_35 : f32 to vector<1x128xf32>
    %154 = arith.minimumf %152, %153 : vector<1x128xf32>
    %155 = arith.addf %146, %154 : vector<1x128xf32>
    %c17 = arith.constant 17 : index
    %156 = memref.load %arg1[%c17] : memref<24xf32, #tpu.memory_space<smem>>
    %157 = vector.broadcast %156 : f32 to vector<1x128xf32>
    %158 = arith.mulf %0, %157 : vector<1x128xf32>
    %c17_36 = arith.constant 17 : index
    %159 = memref.load %arg2[%c17_36] : memref<24xf32, #tpu.memory_space<smem>>
    %160 = vector.broadcast %159 : f32 to vector<1x128xf32>
    %161 = arith.addf %158, %160 : vector<1x128xf32>
    %cst_37 = arith.constant 0.000000e+00 : f32
    %162 = vector.broadcast %cst_37 : f32 to vector<1x128xf32>
    %163 = arith.maximumf %161, %162 : vector<1x128xf32>
    %164 = arith.addf %155, %163 : vector<1x128xf32>
    %c18 = arith.constant 18 : index
    %165 = memref.load %arg1[%c18] : memref<24xf32, #tpu.memory_space<smem>>
    %166 = vector.broadcast %165 : f32 to vector<1x128xf32>
    %167 = arith.mulf %0, %166 : vector<1x128xf32>
    %c18_38 = arith.constant 18 : index
    %168 = memref.load %arg2[%c18_38] : memref<24xf32, #tpu.memory_space<smem>>
    %169 = vector.broadcast %168 : f32 to vector<1x128xf32>
    %170 = arith.addf %167, %169 : vector<1x128xf32>
    %cst_39 = arith.constant 0.000000e+00 : f32
    %171 = vector.broadcast %cst_39 : f32 to vector<1x128xf32>
    %172 = arith.minimumf %170, %171 : vector<1x128xf32>
    %173 = arith.addf %164, %172 : vector<1x128xf32>
    %c19 = arith.constant 19 : index
    %174 = memref.load %arg1[%c19] : memref<24xf32, #tpu.memory_space<smem>>
    %175 = vector.broadcast %174 : f32 to vector<1x128xf32>
    %176 = arith.mulf %0, %175 : vector<1x128xf32>
    %c19_40 = arith.constant 19 : index
    %177 = memref.load %arg2[%c19_40] : memref<24xf32, #tpu.memory_space<smem>>
    %178 = vector.broadcast %177 : f32 to vector<1x128xf32>
    %179 = arith.addf %176, %178 : vector<1x128xf32>
    %cst_41 = arith.constant 0.000000e+00 : f32
    %180 = vector.broadcast %cst_41 : f32 to vector<1x128xf32>
    %181 = arith.minimumf %179, %180 : vector<1x128xf32>
    %182 = arith.addf %173, %181 : vector<1x128xf32>
    %c20 = arith.constant 20 : index
    %183 = memref.load %arg1[%c20] : memref<24xf32, #tpu.memory_space<smem>>
    %184 = vector.broadcast %183 : f32 to vector<1x128xf32>
    %185 = arith.mulf %0, %184 : vector<1x128xf32>
    %c20_42 = arith.constant 20 : index
    %186 = memref.load %arg2[%c20_42] : memref<24xf32, #tpu.memory_space<smem>>
    %187 = vector.broadcast %186 : f32 to vector<1x128xf32>
    %188 = arith.addf %185, %187 : vector<1x128xf32>
    %cst_43 = arith.constant 0.000000e+00 : f32
    %189 = vector.broadcast %cst_43 : f32 to vector<1x128xf32>
    %190 = arith.minimumf %188, %189 : vector<1x128xf32>
    %191 = arith.addf %182, %190 : vector<1x128xf32>
    %c21 = arith.constant 21 : index
    %192 = memref.load %arg1[%c21] : memref<24xf32, #tpu.memory_space<smem>>
    %193 = vector.broadcast %192 : f32 to vector<1x128xf32>
    %194 = arith.mulf %0, %193 : vector<1x128xf32>
    %c21_44 = arith.constant 21 : index
    %195 = memref.load %arg2[%c21_44] : memref<24xf32, #tpu.memory_space<smem>>
    %196 = vector.broadcast %195 : f32 to vector<1x128xf32>
    %197 = arith.addf %194, %196 : vector<1x128xf32>
    %cst_45 = arith.constant 0.000000e+00 : f32
    %198 = vector.broadcast %cst_45 : f32 to vector<1x128xf32>
    %199 = arith.maximumf %197, %198 : vector<1x128xf32>
    %200 = arith.addf %191, %199 : vector<1x128xf32>
    %c22 = arith.constant 22 : index
    %201 = memref.load %arg1[%c22] : memref<24xf32, #tpu.memory_space<smem>>
    %202 = vector.broadcast %201 : f32 to vector<1x128xf32>
    %203 = arith.mulf %0, %202 : vector<1x128xf32>
    %c22_46 = arith.constant 22 : index
    %204 = memref.load %arg2[%c22_46] : memref<24xf32, #tpu.memory_space<smem>>
    %205 = vector.broadcast %204 : f32 to vector<1x128xf32>
    %206 = arith.addf %203, %205 : vector<1x128xf32>
    %cst_47 = arith.constant 0.000000e+00 : f32
    %207 = vector.broadcast %cst_47 : f32 to vector<1x128xf32>
    %208 = arith.minimumf %206, %207 : vector<1x128xf32>
    %209 = arith.addf %200, %208 : vector<1x128xf32>
    %c23 = arith.constant 23 : index
    %210 = memref.load %arg1[%c23] : memref<24xf32, #tpu.memory_space<smem>>
    %211 = vector.broadcast %210 : f32 to vector<1x128xf32>
    %212 = arith.mulf %0, %211 : vector<1x128xf32>
    %c23_48 = arith.constant 23 : index
    %213 = memref.load %arg2[%c23_48] : memref<24xf32, #tpu.memory_space<smem>>
    %214 = vector.broadcast %213 : f32 to vector<1x128xf32>
    %215 = arith.addf %212, %214 : vector<1x128xf32>
    %cst_49 = arith.constant 0.000000e+00 : f32
    %216 = vector.broadcast %cst_49 : f32 to vector<1x128xf32>
    %217 = arith.maximumf %215, %216 : vector<1x128xf32>
    %218 = arith.addf %209, %217 : vector<1x128xf32>
    %c0_50 = arith.constant 0 : index
    %c0_51 = arith.constant 0 : index
    %219 = vector.load %arg5[%c0_50, %c0_51] : memref<1x128xf32, #tpu.memory_space<vmem>>, vector<1x128xf32>
    tpu.vector_store %arg5[%c0_50, %c0_51], %218 {strides = array<i32>} : memref<1x128xf32, #tpu.memory_space<vmem>>, vector<1x128xf32>,
    return
  }
  func.func @transform_0(%arg0: i32) -> i32 {
    %c0_i32 = arith.constant 0 : i32
    %c0_i32_0 = arith.constant 0 : i32
    return %c0_i32 : i32
  }
  func.func @transform_1(%arg0: i32) -> i32 {
    %c0_i32 = arith.constant 0 : i32
    %c0_i32_0 = arith.constant 0 : i32
    return %c0_i32 : i32
  }
  func.func @transform_2(%arg0: i32) -> i32 {
    %c0_i32 = arith.constant 0 : i32
    %c0_i32_0 = arith.constant 0 : i32
    return %c0_i32 : i32
  }
  func.func @transform_3(%arg0: i32) -> (i32, i32) {
    %c0_i32 = arith.constant 0 : i32
    %c0_i32_0 = arith.constant 0 : i32
    return %arg0, %c0_i32 : i32, i32
  }
  func.func @transform_4(%arg0: i32) -> (i32, i32) {
    %c0_i32 = arith.constant 0 : i32
    %c0_i32_0 = arith.constant 0 : i32
    return %arg0, %c0_i32 : i32, i32
  }
}

</mosaic_0001>

<bundles_post_ra>
// kernel: tpu_custom_call.1
= control target key start
LH: loop header
LB: loop body
LE: loop exit
PB: predicated region body
PF: predicated region fallthrough
CT: control target
= control target key end

     0   :  { %10 = vsyncpa [#allocation5], 0  ;;  %s555_s0 = inlined_call_operand.vmem [shape: f32[24], index: 0, kind: input, shape index: {}]   ;;  %s556_s1 = inlined_call_operand.vmem [shape: f32[24], index: 1, kind: input, shape index: {}]   ;;  %s557_s2 = inlined_call_operand.<no memory space> [shape: f32[1], index: 2, kind: input, shape index: {}]   ;;  %s558_s3 = inlined_call_operand.vmem [shape: f32[1,128], index: 3, kind: input, shape index: {}]   ;;  %s559_s4 = inlined_call_operand.hbm [shape: f32[1,128], index: 4, kind: output, shape index: {}]  }
   0x1   :  { %11 = vsyncpa [#allocation7], 0 }
   0x2   :  { %12 = vsyncpa [#allocation4], 0  ;;  %s19_s17 = sshll.u32 %s555_s0, 4  ;;  %s29_s20 = sshll.u32 %s556_s1, 4  ;;  %s20_s17 = int_to_ptr.vmem [resolvable:$true] %s19_s17  ;;  %s30_s20 = int_to_ptr.vmem [resolvable:$true] %s29_s20 }
   0x3   :  { %s305_s21 = scalar_lea.vmem %s20_s17, 16  ;;  %p310_p1 = scmp.lt.s32.totalorder %s20_s17, %s20_s17 }
   0x4   :  { %p306_p0 = scmp.ne.s32.totalorder %s20_s17, %s305_s21  ;;  %p311_p2 = scmp.lt.s32.totalorder %s305_s21, %s305_s21 }
   0x6   :  { %p312_p3 = por %p311_p2, %p310_p1 }
   0x8   :  { %p313_p4 = pnand %p312_p3, %p306_p0 }
   0xa   :  { %316 = shalt.err (!%p313_p4)
}
   0xb   :  { %s357_s22 = smov [#allocation3]   ;;  %s317_s23 = scalar_lea.vmem %s30_s20, 16 }
   0xc   :  { %22 = dma.vmem_to_smem %s20_s17, 16, %s357_s22, [#allocation5]  }
   0xd   :  { %p318_p5 = scmp.ne.s32.totalorder %s30_s20, %s317_s23  ;;  %p322_p6 = scmp.lt.s32.totalorder %s30_s20, %s30_s20 }
   0xe   :  { %p323_p7 = scmp.lt.s32.totalorder %s317_s23, %s317_s23 }
  0x10   :  { %p324_p8 = por %p323_p7, %p322_p6 }
  0x12   :  { %p325_p9 = pnand %p324_p8, %p318_p5 }
  0x14   :  { %328 = shalt.err (!%p325_p9)
}
  0x15   :  { %s358_s0 = smov [#allocation6]  }
  0x16   :  { %32 = dma.vmem_to_smem %s30_s20, 16, %s358_s0, [#allocation7]  }
  0x17   :  { %351 = dma.done.wait [#allocation5], 16  }
  0x18   :  { %352 = vsyncadd [#allocation5], 4294967280 }
  0x19   :  { %353 = dma.done.wait [#allocation7], 16  }
  0x1a   :  { %354 = vsyncadd [#allocation7], 4294967280 }
  0x1b   :  { %43 = sfence }
  0x1c   :  { %s47_s1 = sld [smem:[#allocation3]]  ;;  %s256_s25 = sld [smem:[#allocation3 + $0x1]]  ;;  %v398_v0 = vld [vmem:[%s558_s3] sm:$0x1]  ;;  %v46_v6 = vstv %s557_s2 }
  0x1d   :  { %s50_s24 = sld [smem:[#allocation6]]  ;;  %s257_s26 = sld [smem:[#allocation6 + $0x1]] }
  0x1e   :  { %s258_s27 = sld [smem:[#allocation3 + $0x2]]  ;;  %s260_s29 = sld [smem:[#allocation3 + $0x3]] }
  0x1f   :  { %s391_s28 = sld [smem:[#allocation6 + $0x2]]  ;;  %s393_s30 = sld [smem:[#allocation6 + $0x3]] }
  0x20   :  { %s262_s7 = sld [smem:[#allocation3 + $0x4]]  ;;  %s402_s9 = sld [smem:[#allocation3 + $0x5]] }
  0x21   :  { %s400_s8 = sld [smem:[#allocation6 + $0x4]]  ;;  %s404_s10 = sld [smem:[#allocation6 + $0x5]] }
  0x22   :  { %v48_v1 = vstv %s47_s1  ;;  %s406_s11 = sld [smem:[#allocation3 + $0x6]]  ;;  %v56_v4 = vstv %s256_s25  ;;  %s411_s3 = sld [smem:[#allocation3 + $0x7]] }
  0x23   :  { %v51_v2 = vstv %s50_s24  ;;  %s408_s12 = sld [smem:[#allocation6 + $0x6]]  ;;  %v49_v3 = vmul.f32 %v48_v1, %v398_v0  ;;  %v59_v5 = vstv %s257_s26  ;;  %v57_v7 = vmul.f32 %v56_v4, %v398_v0  ;;  %s418_s15 = sld [smem:[#allocation6 + $0x7]] }
  0x24   :  { %v64_v8 = vstv %s258_s27  ;;  %s420_s16 = sld [smem:[#allocation3 + $0x8]]  ;;  %v72_v12 = vstv %s260_s29  ;;  %s424_s17 = sld [smem:[#allocation3 + $0x9]] }
  0x25   :  { %v67_v9 = vstv %s391_s28  ;;  %v52_v10 = vadd.f32 %v51_v2, %v49_v3  ;;  %v65_v11 = vmul.f32 %v64_v8, %v398_v0  ;;  %v75_v13 = vstv %s393_s30  ;;  %s428_s2 = sld [smem:[#allocation6 + $0x8]]  ;;  %s432_s18 = sld [smem:[#allocation3 + $0xa]] }
  0x26   :  { %v60_v14 = vadd.f32 %v59_v5, %v57_v7  ;;  %v73_v15 = vmul.f32 %v72_v12, %v398_v0  ;;  %v80_v16 = vstv %s262_s7  ;;  %v88_v21 = vstv %s402_s9  ;;  %s436_s19 = sld [smem:[#allocation6 + $0x9]]  ;;  %s438_s20 = sld [smem:[#allocation3 + $0xb]] }
  0x27   :  { %v83_v17 = vstv %s400_s8  ;;  %v53_v18 = vmin.f32 %v52_v10, 0.0  ;;  %v68_v19 = vadd.f32 %v67_v9, %v65_v11  ;;  %v81_v20 = vmul.f32 %v80_v16, %v398_v0  ;;  %s443_s21 = sld [smem:[#allocation6 + $0xa]]  ;;  %s445_s22 = sld [smem:[#allocation3 + $0xc]] }
  0x28   :  { %v61_v22 = vmax.f32 %v60_v14, 0.0  ;;  %v76_v23 = vadd.f32 %v75_v13, %v73_v15  ;;  %v89_v24 = vmul.f32 %v88_v21, %v398_v0  ;;  %v91_v25 = vstv %s404_s10  ;;  %s451_s23 = sld [smem:[#allocation6 + $0xb]]  ;;  %s453_s0 = sld [smem:[#allocation3 + $0xd]] }
  0x29   :  { %v54_v26 = vadd.f32 %v53_v18, %v46_v6  ;;  %v69_v27 = vmin.f32 %v68_v19, 0.0  ;;  %v84_v28 = vadd.f32 %v83_v17, %v81_v20  ;;  %v96_v29 = vstv %s406_s11  ;;  %s458_s1 = sld [smem:[#allocation6 + $0xc]]  ;;  %s460_s24 = sld [smem:[#allocation3 + $0xe]] }
  0x2a   :  { %v92_v30 = vadd.f32 %v91_v25, %v89_v24  ;;  %v97_v31 = vmul.f32 %v96_v29, %v398_v0  ;;  %v99_v32 = vstv %s408_s12  ;;  %v77_v34 = vmin.f32 %v76_v23, 0.0  ;;  %s466_s25 = sld [smem:[#allocation6 + $0xd]]  ;;  %s468_s26 = sld [smem:[#allocation3 + $0xf]] }
  0x2b   :  { %v62_v33 = vadd.f32 %v61_v22, %v54_v26  ;;  %v104_v35 = vstv %s411_s3  ;;  %v85_v36 = vmax.f32 %v84_v28, 0.0  ;;  %v107_v38 = vstv %s418_s15  ;;  %s473_s27 = sld [smem:[#allocation6 + $0xe]]  ;;  %s475_s28 = sld [smem:[#allocation3 + $0x10]] }
  0x2c   :  { %v105_v37 = vmul.f32 %v104_v35, %v398_v0  ;;  %v112_v39 = vstv %s420_s16  ;;  %v100_v41 = vadd.f32 %v99_v32, %v97_v31  ;;  %v120_v43 = vstv %s424_s17  ;;  %s480_s29 = sld [smem:[#allocation6 + $0xf]]  ;;  %s482_s30 = sld [smem:[#allocation3 + $0x11]] }
  0x2d   :  { %v70_v40 = vadd.f32 %v69_v27, %v62_v33  ;;  %v113_v42 = vmul.f32 %v112_v39, %v398_v0  ;;  %v93_v44 = vmax.f32 %v92_v30, 0.0  ;;  %v115_v45 = vstv %s428_s2  ;;  %s487_s5 = sld [smem:[#allocation6 + $0x10]]  ;;  %s489_s6 = sld [smem:[#allocation3 + $0x12]] }
  0x2e   :  { %v108_v47 = vadd.f32 %v107_v38, %v105_v37  ;;  %v121_v48 = vmul.f32 %v120_v43, %v398_v0  ;;  %v128_v49 = vstv %s432_s18  ;;  %v123_v50 = vstv %s436_s19  ;;  %s494_s7 = sld [smem:[#allocation6 + $0x11]]  ;;  %s496_s8 = sld [smem:[#allocation3 + $0x13]] }
  0x2f   :  { %v78_v46 = vadd.f32 %v77_v34, %v70_v40  ;;  %v136_v51 = vstv %s438_s20  ;;  %v101_v53 = vmax.f32 %v100_v41, 0.0  ;;  %v116_v54 = vadd.f32 %v115_v45, %v113_v42  ;;  %s501_s9 = sld [smem:[#allocation6 + $0x12]]  ;;  %s503_s10 = sld [smem:[#allocation3 + $0x14]] }
  0x30   :  { %v129_v55 = vmul.f32 %v128_v49, %v398_v0  ;;  %v131_v56 = vstv %s443_s21  ;;  %v144_v57 = vstv %s445_s22  ;;  %v109_v59 = vmax.f32 %v108_v47, 0.0  ;;  %s508_s11 = sld [smem:[#allocation6 + $0x13]]  ;;  %s510_s12 = sld [smem:[#allocation3 + $0x15]] }
  0x31   :  { %v86_v52 = vadd.f32 %v85_v36, %v78_v46  ;;  %v124_v60 = vadd.f32 %v123_v50, %v121_v48  ;;  %v137_v61 = vmul.f32 %v136_v51, %v398_v0  ;;  %v139_v62 = vstv %s451_s23  ;;  %s515_s3 = sld [smem:[#allocation6 + $0x14]]  ;;  %s517_s13 = sld [smem:[#allocation3 + $0x16]] }
  0x32   :  { %v152_v63 = vstv %s453_s0  ;;  %v117_v2 = vmin.f32 %v116_v54, 0.0  ;;  %v132_v3 = vadd.f32 %v131_v56, %v129_v55  ;;  %v145_v4 = vmul.f32 %v144_v57, %v398_v0  ;;  %s522_s14 = sld [smem:[#allocation6 + $0x15]]  ;;  %s524_s15 = sld [smem:[#allocation3 + $0x17]] }
  0x33   :  { %v94_v58 = vadd.f32 %v93_v44, %v86_v52  ;;  %v147_v5 = vstv %s458_s1  ;;  %v160_v6 = vstv %s460_s24  ;;  %v125_v8 = vmax.f32 %v124_v60, 0.0  ;;  %s529_s16 = sld [smem:[#allocation6 + $0x16]]  ;;  %s301_s17 = sld [smem:[#allocation6 + $0x17]] }
  0x34   :  { %v140_v9 = vadd.f32 %v139_v62, %v137_v61  ;;  %v153_v10 = vmul.f32 %v152_v63, %v398_v0  ;;  %v155_v11 = vstv %s466_s25  ;;  %v168_v12 = vstv %s468_s26  ;;  %s359_s2 = smov [#allocation8]  }
  0x35   :  { %v102_v1 = vadd.f32 %v101_v53, %v94_v58  ;;  %v133_v14 = vmin.f32 %v132_v3, 0.0  ;;  %v148_v15 = vadd.f32 %v147_v5, %v145_v4  ;;  %v161_v16 = vmul.f32 %v160_v6, %v398_v0  ;;  %s246_s18 = sshll.u32 %s359_s2, 4  ;;  %s247_s18 = int_to_ptr.vmem [resolvable:$true] %s246_s18 }
  0x36   :  { %v163_v17 = vstv %s473_s27  ;;  %v176_v18 = vstv %s475_s28  ;;  %v141_v20 = vmax.f32 %v140_v9, 0.0  ;;  %v156_v21 = vadd.f32 %v155_v11, %v153_v10  ;;  %s329_s19 = scalar_lea.vmem %s247_s18, 16  ;;  %s333_s20 = scalar_lea.vmem %s247_s18, 32 }
  0x37   :  { %v110_v7 = vadd.f32 %v109_v59, %v102_v1  ;;  %v169_v22 = vmul.f32 %v168_v12, %v398_v0  ;;  %v171_v23 = vstv %s480_s29  ;;  %v184_v24 = vstv %s482_s30  ;;  %p330_p10 = scmp.ne.s32.totalorder %s247_s18, %s329_s19  ;;  %p334_p11 = scmp.lt.s32.totalorder %s247_s18, %s247_s18 }
  0x38   :  { %v149_v26 = vmax.f32 %v148_v15, 0.0  ;;  %v164_v27 = vadd.f32 %v163_v17, %v161_v16  ;;  %v177_v28 = vmul.f32 %v176_v18, %v398_v0  ;;  %v179_v29 = vstv %s487_s5  ;;  %p335_p12 = scmp.lt.s32.totalorder %s333_s20, %s329_s19 }
  0x39   :  { %v118_v13 = vadd.f32 %v117_v2, %v110_v7  ;;  %v192_v30 = vstv %s489_s6  ;;  %v157_v32 = vmax.f32 %v156_v21, 0.0  ;;  %v172_v33 = vadd.f32 %v171_v23, %v169_v22 }
  0x3a   :  { %v185_v34 = vmul.f32 %v184_v24, %v398_v0  ;;  %v187_v35 = vstv %s494_s7  ;;  %v200_v36 = vstv %s496_s8  ;;  %v165_v38 = vmin.f32 %v164_v27, 0.0  ;;  %p336_p13 = por %p335_p12, %p334_p11 }
  0x3b   :  { %v126_v19 = vadd.f32 %v125_v8, %v118_v13  ;;  %v180_v39 = vadd.f32 %v179_v29, %v177_v28  ;;  %v193_v40 = vmul.f32 %v192_v30, %v398_v0  ;;  %v195_v41 = vstv %s501_s9 }
  0x3c   :  { %v208_v42 = vstv %s503_s10  ;;  %v173_v44 = vmax.f32 %v172_v33, 0.0  ;;  %v188_v45 = vadd.f32 %v187_v35, %v185_v34  ;;  %v201_v46 = vmul.f32 %v200_v36, %v398_v0  ;;  %p337_p0 = pnand %p336_p13, %p330_p10 }
  0x3d   :  { %v134_v25 = vadd.f32 %v133_v14, %v126_v19  ;;  %v203_v47 = vstv %s508_s11  ;;  %v216_v48 = vstv %s510_s12  ;;  %v181_v50 = vmin.f32 %v180_v39, 0.0 }
  0x3e   :  { %v196_v51 = vadd.f32 %v195_v41, %v193_v40  ;;  %v209_v52 = vmul.f32 %v208_v42, %v398_v0  ;;  %v211_v53 = vstv %s515_s3  ;;  %v224_v54 = vstv %s517_s13 }
  0x3f   :  { %v142_v31 = vadd.f32 %v141_v20, %v134_v25  ;;  %v189_v56 = vmax.f32 %v188_v45, 0.0  ;;  %v204_v57 = vadd.f32 %v203_v47, %v201_v46  ;;  %v217_v58 = vmul.f32 %v216_v48, %v398_v0 }
  0x40   :  { %v219_v59 = vstv %s522_s14  ;;  %v232_v60 = vstv %s524_s15  ;;  %v197_v62 = vmin.f32 %v196_v51, 0.0  ;;  %v212_v63 = vadd.f32 %v211_v53, %v209_v52 }
  0x41   :  { %v150_v37 = vadd.f32 %v149_v26, %v142_v31  ;;  %v225_v1 = vmul.f32 %v224_v54, %v398_v0  ;;  %v227_v2 = vstv %s529_s16  ;;  %v205_v4 = vmin.f32 %v204_v57, 0.0 }
  0x42   :  { %v220_v5 = vadd.f32 %v219_v59, %v217_v58  ;;  %v233_v6 = vmul.f32 %v232_v60, %v398_v0  ;;  %v235_v7 = vstv %s301_s17  ;;  %v213_v9 = vmin.f32 %v212_v63, 0.0 }
  0x43   :  { %v158_v43 = vadd.f32 %v157_v32, %v150_v37  ;;  %v228_v10 = vadd.f32 %v227_v2, %v225_v1 }
  0x44   :  { %v221_v12 = vmax.f32 %v220_v5, 0.0  ;;  %v236_v13 = vadd.f32 %v235_v7, %v233_v6 }
  0x45   :  { %v166_v49 = vadd.f32 %v165_v38, %v158_v43  ;;  %v229_v15 = vmin.f32 %v228_v10, 0.0 }
  0x46   :  { %v237_v17 = vmax.f32 %v236_v13, 0.0 }
  0x47   :  { %v174_v55 = vadd.f32 %v173_v44, %v166_v49 }
  0x49   :  { %v182_v61 = vadd.f32 %v181_v50, %v174_v55 }
  0x4b   :  { %v190_v3 = vadd.f32 %v189_v56, %v182_v61 }
  0x4d   :  { %v198_v8 = vadd.f32 %v197_v62, %v190_v3 }
  0x4f   :  { %v206_v11 = vadd.f32 %v205_v4, %v198_v8 }
  0x51   :  { %v214_v14 = vadd.f32 %v213_v9, %v206_v11 }
  0x53   :  { %v222_v16 = vadd.f32 %v221_v12, %v214_v14 }
  0x55   :  { %v230_v18 = vadd.f32 %v229_v15, %v222_v16 }
  0x57   :  { %v238_v19 = vadd.f32 %v237_v17, %v230_v18 }
  0x59   :  { %239 = vst [vmem:[#allocation8] sm:$0x1] %v238_v19 }
  0x5a   :  { %340 = shalt.err (!%p337_p0)
}
  0x5b   :  { %s341_s23 = scalar_lea.hbm %s559_s4, 16 }
  0x5c   :  { %p342_p1 = scmp.ne.s32.totalorder %s559_s4, %s341_s23  ;;  %p345_p2 = scmp.lt.u32.totalorder %s341_s23, %s559_s4 }
  0x5e   :  { %p347_p3 = pnand %p345_p2, %p342_p1 }
  0x60   :  { %350 = shalt.err (!%p347_p3)
}
  0x61   :  { %249 = dma.vmem_to_hbm [thread:$0]  %s247_s18, 16, %s559_s4, [#allocation4]  }
  0x62   :  { %355 = dma.done.wait [#allocation4], 16  }
  0x63   :  { %356 = vsyncadd [#allocation4], 4294967280 }
  0x64   :  { %253 = vsyncpa [#allocation4], 1 }
  0x65   :  { %254 = vsyncpa [#allocation5], 1 }
  0x66   :  { %255 = vsyncpa [#allocation7], 1 }

</bundles_post_ra>
